<compile_context>
chip_gen: v5e
topology: v5e:2x2
jax: 0.10.0
libtpu: 0.0.40
codegen_flags: <defaults>
</compile_context>

<pallas_src>
import functools

import jax
import jax.numpy as jnp
from jax.experimental import pallas as pl
from jax.experimental.pallas import tpu as pltpu

EPS = 1e-5


# ---------------------------------------------------------------------------
# Pallas kernel: fused 3x3 conv (stride 1, pad 1) + per-channel affine + ReLU
# ---------------------------------------------------------------------------
def _convblock_kernel(x_ref, w_ref, scale_ref, shift_ref, mask_ref,
                      out_ref, col_ref, *, W, Cin):
    """One block of `bn` images per grid step, channel-major flat layout.

    x_ref:     (Cin,  L)       L = bn*H*W, flat input images (lane-dense)
    w_ref:     (Cout, 9*Cin)   conv taps, columns ordered (ky, kx, cin)
    scale_ref: (Cout, 1)       folded BN scale (f32)
    shift_ref: (Cout, 1)       folded BN shift incl. conv bias (f32)
    mask_ref:  (9,    L)       per-tap border mask (implements zero padding)
    out_ref:   (Cout, L)
    col_ref:   (9*Cin, L)      transposed im2col VMEM scratch
    """
    L = x_ref.shape[-1]
    x = x_ref[...]                                        # (Cin, L)

    # Transposed im2col: each tap = one XLU lane-roll of the flat image
    # followed by a border-mask multiply; stores into col_ref are lane-dense.
    for ky in range(3):
        for kx in range(3):
            t = ky * 3 + kx
            off = (ky - 1) * W + (kx - 1)                 # flat tap offset
            if off == 0:
                part = x                                  # center tap: no shift, mask == 1
            else:
                shifted = pltpu.roll(x, shift=(-off) % L, axis=1)
                part = shifted * mask_ref[t:t + 1, :]
            col_ref[t * Cin:(t + 1) * Cin, :] = part

    # Single MXU matmul (transposed product) + folded BN affine + ReLU.
    acc = jnp.dot(w_ref[...], col_ref[...],
                  preferred_element_type=jnp.float32)     # (Cout, L) f32
    y = acc * scale_ref[...] + shift_ref[...]
    out_ref[...] = jnp.maximum(y, 0.0).astype(out_ref.dtype)


# ---------------------------------------------------------------------------
# Wrapper
# ---------------------------------------------------------------------------
def convblock_forward(x_nchw, w_oihw, scale, shift, *, images_per_step=None):
    """Fused Conv2d(3x3, s=1, p=1) + folded BatchNorm + ReLU.

    x_nchw: (N, Cin, H, W)   PyTorch layout
    w_oihw: (Cout, Cin, 3, 3) PyTorch layout
    scale/shift: (Cout,) folded BN affine (see fold_bn)
    Returns (N, Cout, H, W).
    """
    N, Cin, H, W = x_nchw.shape
    Cout = w_oihw.shape[0]
    dtype = x_nchw.dtype

    if images_per_step is None:
        # Whole batch per step while the flat block stays small: amortizes the
        # ~0.35 us per-step overhead.  Larger feature maps fall back to 1/step
        # (for realistic decoder sizes, also tile H and re-derive VMEM).
        images_per_step = N if N * H * W <= (1 << 16) else 1
    bn = images_per_step
    assert N % bn == 0, "images_per_step must divide N"
    n_steps = N // bn
    L = bn * H * W
    assert n_steps == 1 or L % 128 == 0, "per-step lane extent must be 128-aligned"

    # Channel-major, flat-spatial layout (lane axis = bn*H*W, lane-dense).
    x_t = jnp.transpose(x_nchw, (1, 0, 2, 3)).reshape(Cin, N * H * W)

    # Weight columns ordered (ky, kx, cin) to match the im2col row order.
    w_mat = jnp.transpose(w_oihw, (0, 2, 3, 1)).reshape(Cout, 9 * Cin).astype(dtype)
    scale2 = scale.reshape(Cout, 1).astype(jnp.float32)
    shift2 = shift.reshape(Cout, 1).astype(jnp.float32)

    # Per-tap border masks (zero padding); period H*W, tiled over the bn images.
    yy = jnp.arange(H).reshape(H, 1)
    xx = jnp.arange(W).reshape(1, W)
    mask_rows = []
    for ky in range(3):
        for kx in range(3):
            dy, dx = ky - 1, kx - 1
            valid = ((yy + dy >= 0) & (yy + dy < H) &
                     (xx + dx >= 0) & (xx + dx < W))
            mask_rows.append(valid.reshape(-1))
    masks = jnp.tile(jnp.stack(mask_rows, axis=0), (1, bn)).astype(dtype)   # (9, L)

    kern = functools.partial(_convblock_kernel, W=W, Cin=Cin)
    out_t = pl.pallas_call(
        kern,
        out_shape=jax.ShapeDtypeStruct((Cout, N * H * W), dtype),
        grid=(n_steps,),
        in_specs=[
            pl.BlockSpec((Cin, L), lambda i: (0, i)),          # x (lane-dense)
            pl.BlockSpec((Cout, 9 * Cin), lambda i: (0, 0)),   # weights
            pl.BlockSpec((Cout, 1), lambda i: (0, 0)),         # BN scale
            pl.BlockSpec((Cout, 1), lambda i: (0, 0)),         # BN shift
            pl.BlockSpec((9, L), lambda i: (0, 0)),            # border masks
        ],
        out_specs=pl.BlockSpec((Cout, L), lambda i: (0, i)),   # out (lane-dense)
        scratch_shapes=[pltpu.VMEM((9 * Cin, L), dtype)],      # transposed im2col
        compiler_params=pltpu.CompilerParams(
            dimension_semantics=("parallel",),
            vmem_limit_bytes=32 * 1024 * 1024),
    )(x_t, w_mat, scale2, shift2, masks)

    return jnp.transpose(out_t.reshape(Cout, N, H, W), (1, 0, 2, 3))


# ---------------------------------------------------------------------------
# Parameter helpers / reference
# ---------------------------------------------------------------------------
def fold_bn(conv_bias, gamma, beta, running_mean, running_var, eps=EPS):
    """Fold conv bias + inference-mode BatchNorm into per-channel (scale, shift)."""
    inv = gamma / jnp.sqrt(running_var + eps)
    return inv, beta + (conv_bias - running_mean) * inv


def reference(x_nchw, w_oihw, bias, gamma, beta, mean, var, eps=EPS):
    """Pure-JAX reference of convblock (inference-mode BN), NCHW layout."""
    y = jax.lax.conv_general_dilated(
        x_nchw, w_oihw, window_strides=(1, 1), padding=((1, 1), (1, 1)),
        dimension_numbers=("NCHW", "OIHW", "NCHW"),
        precision=jax.lax.Precision.HIGHEST)
    y = y + bias[None, :, None, None]
    y = (y - mean[None, :, None, None]) / jnp.sqrt(var[None, :, None, None] + eps)
    y = y * gamma[None, :, None, None] + beta[None, :, None, None]
    return jnp.maximum(y, 0.0)


# ---------------------------------------------------------------------------
if __name__ == "__main__":
    in_ch, out_ch = 4, 8
    N, H, W = 2, 16, 16

    key = jax.random.PRNGKey(0)
    k0, k1, k2, k3, k4, k5, k6 = jax.random.split(key, 7)

    # PyTorch-layout inputs / parameters.
    x = jax.random.normal(k0, (N, in_ch, H, W), jnp.float32)               # NCHW
    fan_in = in_ch * 9
    w = jax.random.normal(k1, (out_ch, in_ch, 3, 3), jnp.float32) / jnp.sqrt(float(fan_in))
    bias = 0.1 * jax.random.normal(k2, (out_ch,), jnp.float32)
    gamma = 1.0 + 0.1 * jax.random.normal(k3, (out_ch,), jnp.float32)
    beta = 0.1 * jax.random.normal(k4, (out_ch,), jnp.float32)
    running_mean = 0.1 * jax.random.normal(k5, (out_ch,), jnp.float32)
    running_var = 1.0 + 0.1 * jnp.abs(jax.random.normal(k6, (out_ch,), jnp.float32))

    scale, shift = fold_bn(bias, gamma, beta, running_mean, running_var)

    out = convblock_forward(x, w, scale, shift)
    out = jax.block_until_ready(out)
    assert out.shape == (N, out_ch, H, W)

    ref = jax.block_until_ready(
        reference(x, w, bias, gamma, beta, running_mean, running_var))
    max_err = float(jnp.max(jnp.abs(out - ref)))
    # f32 inputs + f32 MXU accumulation: errors should be ~1e-6; 1e-4 still
    # catches any indexing/layout bug (those produce O(1) errors).
    assert max_err < 1e-4, f"max abs err {max_err}"

    print("KERNEL_OK")
</pallas_src>

<mosaic_0001>
module attributes {stable_mosaic.version = 11 : i64} {
  func.func @_convblock_kernel(%arg0: i32, %arg1: memref<4x512xf32, #tpu.memory_space<vmem>>, %arg2: memref<8x36xf32, #tpu.memory_space<vmem>>, %arg3: memref<8x1xf32, #tpu.memory_space<vmem>>, %arg4: memref<8x1xf32, #tpu.memory_space<vmem>>, %arg5: memref<9x512xf32, #tpu.memory_space<vmem>>, %arg6: memref<8x512xf32, #tpu.memory_space<vmem>>, %arg7: memref<36x512xf32, #tpu.memory_space<vmem>>) attributes {dimension_semantics = [#tpu.dimension_semantics<parallel>], iteration_bounds = array<i64: 1>, scalar_prefetch = 0 : i64, scratch_operands = 1 : i64, tpu.core_type = #tpu.core_type<tc>, window_params = [{transform_indices = @transform_0, window_bounds = array<i64: 4, 512>}, {pipeline_mode = #tpu.pipeline_mode<synchronous>, transform_indices = @transform_1, window_bounds = array<i64: 8, 36>}, {pipeline_mode = #tpu.pipeline_mode<synchronous>, transform_indices = @transform_2, window_bounds = array<i64: 8, 1>}, {pipeline_mode = #tpu.pipeline_mode<synchronous>, transform_indices = @transform_3, window_bounds = array<i64: 8, 1>}, {pipeline_mode = #tpu.pipeline_mode<synchronous>, transform_indices = @transform_4, window_bounds = array<i64: 9, 512>}, {transform_indices = @transform_5, window_bounds = array<i64: 8, 512>}]} {
    %c0 = arith.constant 0 : index
    %c0_0 = arith.constant 0 : index
    %0 = vector.load %arg1[%c0, %c0_0] : memref<4x512xf32, #tpu.memory_space<vmem>>, vector<4x512xf32>
    %c17_i32 = arith.constant 17 : i32
    %1 = tpu.dynamic_rotate %0 by %c17_i32 dim 1 : vector<4x512xf32>, i32 -> vector<4x512xf32>
    %c0_1 = arith.constant 0 : index
    %c0_2 = arith.constant 0 : index
    %2 = vector.load %arg5[%c0_1, %c0_2] : memref<9x512xf32, #tpu.memory_space<vmem>>, vector<1x512xf32>
    %3 = vector.broadcast %2 : vector<1x512xf32> to vector<4x512xf32>
    %4 = arith.mulf %1, %3 : vector<4x512xf32>
    %c0_3 = arith.constant 0 : index
    %c0_4 = arith.constant 0 : index
    %5 = vector.load %arg7[%c0_3, %c0_4] : memref<36x512xf32, #tpu.memory_space<vmem>>, vector<4x512xf32>
    tpu.vector_store %arg7[%c0_3, %c0_4], %4 {strides = array<i32>} : memref<36x512xf32, #tpu.memory_space<vmem>>, vector<4x512xf32>,
    %c16_i32 = arith.constant 16 : i32
    %6 = tpu.dynamic_rotate %0 by %c16_i32 dim 1 : vector<4x512xf32>, i32 -> vector<4x512xf32>
    %c1 = arith.constant 1 : index
    %c0_5 = arith.constant 0 : index
    %7 = vector.load %arg5[%c1, %c0_5] : memref<9x512xf32, #tpu.memory_space<vmem>>, vector<1x512xf32>
    %8 = vector.broadcast %7 : vector<1x512xf32> to vector<4x512xf32>
    %9 = arith.mulf %6, %8 : vector<4x512xf32>
    %c4 = arith.constant 4 : index
    %c0_6 = arith.constant 0 : index
    %10 = vector.load %arg7[%c4, %c0_6] : memref<36x512xf32, #tpu.memory_space<vmem>>, vector<4x512xf32>
    tpu.vector_store %arg7[%c4, %c0_6], %9 {strides = array<i32>} : memref<36x512xf32, #tpu.memory_space<vmem>>, vector<4x512xf32>,
    %c15_i32 = arith.constant 15 : i32
    %11 = tpu.dynamic_rotate %0 by %c15_i32 dim 1 : vector<4x512xf32>, i32 -> vector<4x512xf32>
    %c2 = arith.constant 2 : index
    %c0_7 = arith.constant 0 : index
    %12 = vector.load %arg5[%c2, %c0_7] : memref<9x512xf32, #tpu.memory_space<vmem>>, vector<1x512xf32>
    %13 = vector.broadcast %12 : vector<1x512xf32> to vector<4x512xf32>
    %14 = arith.mulf %11, %13 : vector<4x512xf32>
    %c8 = arith.constant 8 : index
    %c0_8 = arith.constant 0 : index
    %15 = vector.load %arg7[%c8, %c0_8] : memref<36x512xf32, #tpu.memory_space<vmem>>, vector<4x512xf32>
    tpu.vector_store %arg7[%c8, %c0_8], %14 {strides = array<i32>} : memref<36x512xf32, #tpu.memory_space<vmem>>, vector<4x512xf32>,
    %c1_i32 = arith.constant 1 : i32
    %16 = tpu.dynamic_rotate %0 by %c1_i32 dim 1 : vector<4x512xf32>, i32 -> vector<4x512xf32>
    %c3 = arith.constant 3 : index
    %c0_9 = arith.constant 0 : index
    %17 = vector.load %arg5[%c3, %c0_9] : memref<9x512xf32, #tpu.memory_space<vmem>>, vector<1x512xf32>
    %18 = vector.broadcast %17 : vector<1x512xf32> to vector<4x512xf32>
    %19 = arith.mulf %16, %18 : vector<4x512xf32>
    %c12 = arith.constant 12 : index
    %c0_10 = arith.constant 0 : index
    %20 = vector.load %arg7[%c12, %c0_10] : memref<36x512xf32, #tpu.memory_space<vmem>>, vector<4x512xf32>
    tpu.vector_store %arg7[%c12, %c0_10], %19 {strides = array<i32>} : memref<36x512xf32, #tpu.memory_space<vmem>>, vector<4x512xf32>,
    %c16 = arith.constant 16 : index
    %c0_11 = arith.constant 0 : index
    %21 = vector.load %arg7[%c16, %c0_11] : memref<36x512xf32, #tpu.memory_space<vmem>>, vector<4x512xf32>
    tpu.vector_store %arg7[%c16, %c0_11], %0 {strides = array<i32>} : memref<36x512xf32, #tpu.memory_space<vmem>>, vector<4x512xf32>,
    %c511_i32 = arith.constant 511 : i32
    %22 = tpu.dynamic_rotate %0 by %c511_i32 dim 1 : vector<4x512xf32>, i32 -> vector<4x512xf32>
    %c5 = arith.constant 5 : index
    %c0_12 = arith.constant 0 : index
    %23 = vector.load %arg5[%c5, %c0_12] : memref<9x512xf32, #tpu.memory_space<vmem>>, vector<1x512xf32>
    %24 = vector.broadcast %23 : vector<1x512xf32> to vector<4x512xf32>
    %25 = arith.mulf %22, %24 : vector<4x512xf32>
    %c20 = arith.constant 20 : index
    %c0_13 = arith.constant 0 : index
    %26 = vector.load %arg7[%c20, %c0_13] : memref<36x512xf32, #tpu.memory_space<vmem>>, vector<4x512xf32>
    tpu.vector_store %arg7[%c20, %c0_13], %25 {strides = array<i32>} : memref<36x512xf32, #tpu.memory_space<vmem>>, vector<4x512xf32>,
    %c497_i32 = arith.constant 497 : i32
    %27 = tpu.dynamic_rotate %0 by %c497_i32 dim 1 : vector<4x512xf32>, i32 -> vector<4x512xf32>
    %c6 = arith.constant 6 : index
    %c0_14 = arith.constant 0 : index
    %28 = vector.load %arg5[%c6, %c0_14] : memref<9x512xf32, #tpu.memory_space<vmem>>, vector<1x512xf32>
    %29 = vector.broadcast %28 : vector<1x512xf32> to vector<4x512xf32>
    %30 = arith.mulf %27, %29 : vector<4x512xf32>
    %c24 = arith.constant 24 : index
    %c0_15 = arith.constant 0 : index
    %31 = vector.load %arg7[%c24, %c0_15] : memref<36x512xf32, #tpu.memory_space<vmem>>, vector<4x512xf32>
    tpu.vector_store %arg7[%c24, %c0_15], %30 {strides = array<i32>} : memref<36x512xf32, #tpu.memory_space<vmem>>, vector<4x512xf32>,
    %c496_i32 = arith.constant 496 : i32
    %32 = tpu.dynamic_rotate %0 by %c496_i32 dim 1 : vector<4x512xf32>, i32 -> vector<4x512xf32>
    %c7 = arith.constant 7 : index
    %c0_16 = arith.constant 0 : index
    %33 = vector.load %arg5[%c7, %c0_16] : memref<9x512xf32, #tpu.memory_space<vmem>>, vector<1x512xf32>
    %34 = vector.broadcast %33 : vector<1x512xf32> to vector<4x512xf32>
    %35 = arith.mulf %32, %34 : vector<4x512xf32>
    %c28 = arith.constant 28 : index
    %c0_17 = arith.constant 0 : index
    %36 = vector.load %arg7[%c28, %c0_17] : memref<36x512xf32, #tpu.memory_space<vmem>>, vector<4x512xf32>
    tpu.vector_store %arg7[%c28, %c0_17], %35 {strides = array<i32>} : memref<36x512xf32, #tpu.memory_space<vmem>>, vector<4x512xf32>,
    %c495_i32 = arith.constant 495 : i32
    %37 = tpu.dynamic_rotate %0 by %c495_i32 dim 1 : vector<4x512xf32>, i32 -> vector<4x512xf32>
    %c8_18 = arith.constant 8 : index
    %c0_19 = arith.constant 0 : index
    %38 = vector.load %arg5[%c8_18, %c0_19] : memref<9x512xf32, #tpu.memory_space<vmem>>, vector<1x512xf32>
    %39 = vector.broadcast %38 : vector<1x512xf32> to vector<4x512xf32>
    %40 = arith.mulf %37, %39 : vector<4x512xf32>
    %c32 = arith.constant 32 : index
    %c0_20 = arith.constant 0 : index
    %41 = vector.load %arg7[%c32, %c0_20] : memref<36x512xf32, #tpu.memory_space<vmem>>, vector<4x512xf32>
    tpu.vector_store %arg7[%c32, %c0_20], %40 {strides = array<i32>} : memref<36x512xf32, #tpu.memory_space<vmem>>, vector<4x512xf32>,
    %c0_21 = arith.constant 0 : index
    %c0_22 = arith.constant 0 : index
    %42 = vector.load %arg2[%c0_21, %c0_22] : memref<8x36xf32, #tpu.memory_space<vmem>>, vector<8x36xf32>
    %c0_23 = arith.constant 0 : index
    %c0_24 = arith.constant 0 : index
    %43 = vector.load %arg7[%c0_23, %c0_24] : memref<36x512xf32, #tpu.memory_space<vmem>>, vector<36x512xf32>
    %cst = arith.constant dense<0.000000e+00> : vector<8x512xf32>
    %44 = tpu.matmul %42, %43, %cst {dimension_numbers = #tpu.dot_dimension_numbers<[1], [0], [0], [1], [0, 0, 1, 1], [], []>} : vector<8x36xf32>, vector<36x512xf32>, vector<8x512xf32> -> vector<8x512xf32>
    %c0_25 = arith.constant 0 : index
    %c0_26 = arith.constant 0 : index
    %45 = vector.load %arg3[%c0_25, %c0_26] : memref<8x1xf32, #tpu.memory_space<vmem>>, vector<8x1xf32>
    %46 = vector.broadcast %45 : vector<8x1xf32> to vector<8x512xf32>
    %47 = arith.mulf %44, %46 : vector<8x512xf32>
    %c0_27 = arith.constant 0 : index
    %c0_28 = arith.constant 0 : index
    %48 = vector.load %arg4[%c0_27, %c0_28] : memref<8x1xf32, #tpu.memory_space<vmem>>, vector<8x1xf32>
    %49 = vector.broadcast %48 : vector<8x1xf32> to vector<8x512xf32>
    %50 = arith.addf %47, %49 : vector<8x512xf32>
    %cst_29 = arith.constant 0.000000e+00 : f32
    %51 = vector.broadcast %cst_29 : f32 to vector<8x512xf32>
    %52 = arith.maximumf %50, %51 : vector<8x512xf32>
    %c0_30 = arith.constant 0 : index
    %c0_31 = arith.constant 0 : index
    %53 = vector.load %arg6[%c0_30, %c0_31] : memref<8x512xf32, #tpu.memory_space<vmem>>, vector<8x512xf32>
    tpu.vector_store %arg6[%c0_30, %c0_31], %52 {strides = array<i32>} : memref<8x512xf32, #tpu.memory_space<vmem>>, vector<8x512xf32>,
    return
  }
  func.func @transform_0(%arg0: i32) -> (i32, i32) {
    %c0_i32 = arith.constant 0 : i32
    %c0_i32_0 = arith.constant 0 : i32
    return %c0_i32, %arg0 : i32, i32
  }
  func.func @transform_1(%arg0: i32) -> (i32, i32) {
    %c0_i32 = arith.constant 0 : i32
    %c0_i32_0 = arith.constant 0 : i32
    %c0_i32_1 = arith.constant 0 : i32
    return %c0_i32, %c0_i32_0 : i32, i32
  }
  func.func @transform_2(%arg0: i32) -> (i32, i32) {
    %c0_i32 = arith.constant 0 : i32
    %c0_i32_0 = arith.constant 0 : i32
    %c0_i32_1 = arith.constant 0 : i32
    return %c0_i32, %c0_i32_0 : i32, i32
  }
  func.func @transform_3(%arg0: i32) -> (i32, i32) {
    %c0_i32 = arith.constant 0 : i32
    %c0_i32_0 = arith.constant 0 : i32
    %c0_i32_1 = arith.constant 0 : i32
    return %c0_i32, %c0_i32_0 : i32, i32
  }
  func.func @transform_4(%arg0: i32) -> (i32, i32) {
    %c0_i32 = arith.constant 0 : i32
    %c0_i32_0 = arith.constant 0 : i32
    %c0_i32_1 = arith.constant 0 : i32
    return %c0_i32, %c0_i32_0 : i32, i32
  }
  func.func @transform_5(%arg0: i32) -> (i32, i32) {
    %c0_i32 = arith.constant 0 : i32
    %c0_i32_0 = arith.constant 0 : i32
    return %c0_i32, %arg0 : i32, i32
  }
}

</mosaic_0001>

<bundles_post_ra>
// kernel: tpu_custom_call.1
= control target key start
LH: loop header
LB: loop body
LE: loop exit
PB: predicated region body
PF: predicated region fallthrough
CT: control target
= control target key end

     0   :  { %10 = vsyncpa [#allocation4], 0  ;;  %s1011_s0 = inlined_call_operand.vmem [shape: f32[4,512], index: 0, kind: input, shape index: {}]   ;;  %s1012_s1 = inlined_call_operand.hbm [shape: f32[8,36], index: 1, kind: input, shape index: {}]   ;;  %s1013_s2 = inlined_call_operand.vmem [shape: f32[8,1], index: 2, kind: input, shape index: {}]   ;;  %s1014_s3 = inlined_call_operand.vmem [shape: f32[8,1], index: 3, kind: input, shape index: {}]   ;;  %s1015_s4 = inlined_call_operand.hbm [shape: f32[9,512], index: 4, kind: input, shape index: {}]   ;;  %s1016_s5 = inlined_call_operand.hbm [shape: f32[8,512], index: 5, kind: output, shape index: {}]  }
   0x1   :  { %11 = vsyncpa [#allocation7], 0 }
   0x2   :  { %12 = vsyncpa [#allocation5], 0  ;;  %s20_s20 = sshll.u32 %s1012_s1, 4  ;;  %s729_s21 = smov [#allocation3]   ;;  %s21_s20 = int_to_ptr.hbm [resolvable:$true] %s20_s20 }
   0x3   :  { %s22_s22 = sshll.u32 %s729_s21, 4  ;;  %s34_s25 = sshll.u32 %s1015_s4, 4  ;;  %s23_s22 = int_to_ptr.vmem [resolvable:$true] %s22_s22  ;;  %s35_s25 = int_to_ptr.hbm [resolvable:$true] %s34_s25 }
   0x4   :  { %25 = dma.hbm_to_vmem [thread:$0]  %s21_s20, 128, %s23_s22, [#allocation4]  }
   0x5   :  { %s730_s26 = smov [#allocation6]   ;;  %s731_s28 = smov 512  }
   0x6   :  { %s36_s27 = sshll.u32 %s730_s26, 4  ;;  %s732_s29 = smov 32   ;;  %s37_s27 = int_to_ptr.vmem [resolvable:$true] %s36_s27 }
   0x7   :  { %42 = dma.hbm_to_vmem [thread:$0]  %s35_s25, 1024, %s37_s27, [#allocation7], %s731_s28, %s731_s28, %s732_s29  }
   0x8   :  { %723 = dma.done.wait [#allocation4], 128  }
   0x9   :  { %724 = vsyncadd [#allocation4], 4294967168 }
   0xa   :  { %725 = dma.done.wait [#allocation7], 1024  }
   0xb   :  { %726 = vsyncadd [#allocation7], 4294966272  ;;  %v782_v0 = vld [vmem:[%s1011_s0 + $0x8] sm:$0xff]  ;;  %v787_v1 = vld [vmem:[%s1011_s0] sm:$0xff]  ;;  %s733_s4 = smov 17   ;;  %s734_s0 = smov 16   ;;  %v74_v39 = vlaneseq }
   0xc   :  { %57 = vst [vmem:[#allocation1 + $0x10] ss:$2 sm:$0xff] %v782_v0  ;;  %s735_s8 = smov 15   ;;  %s736_s9 = smov 1   ;;  %vm488_vm8 = vcmask 1043456   ;;  %vm484_vm9 = vcmask 293888  }
   0xd   :  { %55 = vst [vmem:[#allocation1] ss:$2 sm:$0xff] %v787_v1  ;;  %s737_s10 = smov 127   ;;  %s738_s11 = smov 113   ;;  %v840_v41 = vand.u32 127, %v74_v39 }
   0xe   :  { %s739_s12 = smov 112   ;;  %s740_s13 = smov 111   ;;  %v842_v42 = vld [vmem:[#allocation6] ss:$8 sm:$0xf] }
   0xf   :  { %vm76_vm0 = vcmp.lt.s32.totalorder %v840_v41, 17  ;;  %v85_v43 = vperm.slane %v842_v42, 2  ;;  %v86_v44 = vperm.slane %v842_v42, 3  ;;  %v857_v52 = vld [vmem:[#allocation6 + $0x1] ss:$8 sm:$0xf] }
  0x10   :  { %vm118_vm1 = vcmp.lt.s32.totalorder %v840_v41, 16  ;;  %v129_v53 = vperm.slane %v857_v52, 3  ;;  %v128_v55 = vperm.slane %v857_v52, 2  ;;  %v872_v63 = vld [vmem:[#allocation6 + $0x2] ss:$8 sm:$0xf] }
  0x11   :  { %vm173_vm2 = vcmp.lt.s32.totalorder %v840_v41, 15  ;;  %vm216_vm3 = vcmp.lt.s32.totalorder %v840_v41, 1  ;;  %vm286_vm4 = vcmp.lt.s32.totalorder %v840_v41, 127  ;;  %vm439_vm5 = vcmp.lt.s32.totalorder %v840_v41, 111  ;;  %s616_s20 = sshll.u32 %s1016_s5, 4  ;;  %s617_s20 = int_to_ptr.hbm [resolvable:$true] %s616_s20 }
  0x12   :  { %vm341_vm6 = vcmp.lt.s32.totalorder %v840_v41, 113  ;;  %vm384_vm7 = vcmp.lt.s32.totalorder %v840_v41, 112 }
  0x13   :  { %v61_v2 = vld.sshfl [vmem:[#allocation1 + $0x18] sm:$0xff pattern:$0x75316420]  ;;  %v60_v3 = vld.sshfl [vmem:[#allocation1 + $0x10] sm:$0xff pattern:$0x75316420] }
  0x14   :  { %72 = vrot.lane.b32.xlu1 %v61_v2, %s733_s4  ;;  %70 = vrot.lane.b32.xlu0 %v60_v3, %s733_s4  ;;  %101 = vst [vmem:[#allocation1 + $0x10] ss:$2 sm:$0xff] %v782_v0  ;;  %v794_v4 = vld.sshfl [vmem:[#allocation1] sm:$0xff pattern:$0x75316420]  ;;  %v183_v3 = vperm.slane %v872_v63, 2 }
  0x15   :  { %v59_v5 = vld.sshfl [vmem:[#allocation1 + $0x8] sm:$0xff pattern:$0x75316420] }
  0x16   :  { %99 = vst [vmem:[#allocation1] ss:$2 sm:$0xff] %v787_v1  ;;  %68 = vrot.lane.b32.xlu2 %v59_v5, %s733_s4 }
  0x1b   :  { %v104_v6 = vld.sshfl [vmem:[#allocation1 + $0x10] sm:$0xff pattern:$0x75316420]  ;;  %v105_v7 = vld.sshfl [vmem:[#allocation1 + $0x18] sm:$0xff pattern:$0x75316420] }
  0x1c   :  { %114 = vrot.lane.b32.xlu1 %v104_v6, %s734_s0  ;;  %156 = vst [vmem:[#allocation1 + $0x10] ss:$2 sm:$0xff] %v782_v0 }
  0x1d   :  { %v103_v8 = vld.sshfl [vmem:[#allocation1 + $0x8] sm:$0xff pattern:$0x75316420]  ;;  %v800_v9 = vld.sshfl [vmem:[#allocation1] sm:$0xff pattern:$0x75316420] }
  0x1e   :  { %112 = vrot.lane.b32.xlu0 %v103_v8, %s734_s0  ;;  %154 = vst [vmem:[#allocation1] ss:$2 sm:$0xff] %v787_v1  ;;  %116 = vrot.lane.b32.xlu2 %v105_v7, %s734_s0  ;;  %v885_v8 = vld [vmem:[#allocation6 + $0x3] ss:$8 sm:$0xf] }
  0x23   :  { %v159_v10 = vld.sshfl [vmem:[#allocation1 + $0x10] sm:$0xff pattern:$0x75316420]  ;;  %v160_v11 = vld.sshfl [vmem:[#allocation1 + $0x18] sm:$0xff pattern:$0x75316420] }
  0x24   :  { %169 = vrot.lane.b32.xlu1 %v159_v10, %s735_s8  ;;  %199 = vst [vmem:[#allocation1 + $0x10] ss:$2 sm:$0xff] %v782_v0  ;;  %v227_v10 = vperm.slane %v885_v8, 3 }
  0x25   :  { %v158_v12 = vld.sshfl [vmem:[#allocation1 + $0x8] sm:$0xff pattern:$0x75316420]  ;;  %v807_v13 = vld.sshfl [vmem:[#allocation1] sm:$0xff pattern:$0x75316420] }
  0x26   :  { %167 = vrot.lane.b32.xlu0 %v158_v12, %s735_s8  ;;  %197 = vst [vmem:[#allocation1] ss:$2 sm:$0xff] %v787_v1  ;;  %171 = vrot.lane.b32.xlu2 %v160_v11, %s735_s8 }
  0x2b   :  { %v203_v14 = vld.sshfl [vmem:[#allocation1 + $0x18] sm:$0xff pattern:$0x75316420]  ;;  %v202_v15 = vld.sshfl [vmem:[#allocation1 + $0x10] sm:$0xff pattern:$0x75316420] }
  0x2c   :  { %212 = vrot.lane.b32.xlu1 %v202_v15, %s736_s9  ;;  %254 = vst [vmem:[#allocation1 + $0x10] ss:$2 sm:$0xff] %v782_v0 }
  0x2d   :  { %v200_v16 = vld.sshfl [vmem:[#allocation1] sm:$0xff pattern:$0x75316420]  ;;  %v201_v17 = vld.sshfl [vmem:[#allocation1 + $0x8] sm:$0xff pattern:$0x75316420] }
  0x2e   :  { %210 = vrot.lane.b32.xlu0 %v201_v17, %s736_s9  ;;  %252 = vst [vmem:[#allocation1] ss:$2 sm:$0xff] %v787_v1  ;;  %214 = vrot.lane.b32.xlu2 %v203_v14, %s736_s9 }
  0x33   :  { %v257_v18 = vld.sshfl [vmem:[#allocation1 + $0x10] sm:$0xff pattern:$0x75316420]  ;;  %v258_v19 = vld.sshfl [vmem:[#allocation1 + $0x18] sm:$0xff pattern:$0x75316420] }
  0x34   :  { %265 = vst [vmem:[#allocation2 + $0x28] sm:$0xf] %v257_v18 }
  0x35   :  { %266 = vst [vmem:[#allocation2 + $0x40] sm:$0xf] %v258_v19  ;;  %v255_v20 = vld.sshfl [vmem:[#allocation1] sm:$0xff pattern:$0x75316420] }
  0x36   :  { %269 = vst [vmem:[#allocation1 + $0x10] ss:$2 sm:$0xff] %v782_v0  ;;  %v256_v21 = vld.sshfl [vmem:[#allocation1 + $0x8] sm:$0xff pattern:$0x75316420] }
  0x37   :  { %263 = vst [vmem:[#allocation2 + $0x8] sm:$0xf] %v255_v20 }
  0x38   :  { %264 = vst [vmem:[#allocation2 + $0x88] sm:$0xf] %v256_v21 }
  0x39   :  { %267 = vst [vmem:[#allocation1] ss:$2 sm:$0xff] %v787_v1 }
  0x3d   :  { %v272_v22 = vld.sshfl [vmem:[#allocation1 + $0x10] sm:$0xff pattern:$0x75316420]  ;;  %v273_v23 = vld.sshfl [vmem:[#allocation1 + $0x18] sm:$0xff pattern:$0x75316420] }
  0x3e   :  { %282 = vrot.lane.b32.xlu1 %v272_v22, %s737_s10  ;;  %324 = vst [vmem:[#allocation1 + $0x10] ss:$2 sm:$0xff] %v782_v0  ;;  %284 = vrot.lane.b32.xlu2 %v273_v23, %s737_s10  ;;  %v292_v22 = vld [vmem:[#allocation6 + $0x5] ss:$8 sm:$0xf] }
  0x3f   :  { %v296_v23 = vperm.slane %v292_v22, 2 }
  0x40   :  { %v270_v24 = vld.sshfl [vmem:[#allocation1] sm:$0xff pattern:$0x75316420]  ;;  %v271_v25 = vld.sshfl [vmem:[#allocation1 + $0x8] sm:$0xff pattern:$0x75316420] }
  0x41   :  { %278 = vrot.lane.b32.xlu0 %v270_v24, %s737_s10  ;;  %322 = vst [vmem:[#allocation1] ss:$2 sm:$0xff] %v787_v1 }
  0x45   :  { %v328_v26 = vld.sshfl [vmem:[#allocation1 + $0x18] sm:$0xff pattern:$0x75316420]  ;;  %v327_v27 = vld.sshfl [vmem:[#allocation1 + $0x10] sm:$0xff pattern:$0x75316420] }
  0x46   :  { %337 = vrot.lane.b32.xlu1 %v327_v27, %s738_s11  ;;  %367 = vst [vmem:[#allocation1 + $0x10] ss:$2 sm:$0xff] %v782_v0  ;;  %339 = vrot.lane.b32.xlu2 %v328_v26, %s738_s11  ;;  %v297_v27 = vperm.slane %v292_v22, 3 }
  0x48   :  { %v325_v28 = vld.sshfl [vmem:[#allocation1] sm:$0xff pattern:$0x75316420]  ;;  %v326_v29 = vld.sshfl [vmem:[#allocation1 + $0x8] sm:$0xff pattern:$0x75316420] }
  0x49   :  { %333 = vrot.lane.b32.xlu0 %v325_v28, %s738_s11  ;;  %365 = vst [vmem:[#allocation1] ss:$2 sm:$0xff] %v787_v1 }
  0x4d   :  { %v370_v30 = vld.sshfl [vmem:[#allocation1 + $0x10] sm:$0xff pattern:$0x75316420]  ;;  %v371_v31 = vld.sshfl [vmem:[#allocation1 + $0x18] sm:$0xff pattern:$0x75316420] }
  0x4e   :  { %382 = vrot.lane.b32.xlu1 %v371_v31, %s739_s12  ;;  %422 = vst [vmem:[#allocation1 + $0x10] ss:$2 sm:$0xff] %v782_v0 }
  0x50   :  { %v369_v32 = vld.sshfl [vmem:[#allocation1 + $0x8] sm:$0xff pattern:$0x75316420]  ;;  %v368_v33 = vld.sshfl [vmem:[#allocation1] sm:$0xff pattern:$0x75316420] }
  0x51   :  { %376 = vrot.lane.b32.xlu0 %v368_v33, %s739_s12  ;;  %420 = vst [vmem:[#allocation1] ss:$2 sm:$0xff] %v787_v1  ;;  %v184_v1 = vperm.slane %v872_v63, 3 }
  0x55   :  { %v425_v34 = vld.sshfl [vmem:[#allocation1 + $0x10] sm:$0xff pattern:$0x75316420]  ;;  %v426_v36 = vld.sshfl [vmem:[#allocation1 + $0x18] sm:$0xff pattern:$0x75316420] }
  0x56   :  { %435 = vrot.lane.b32.xlu2 %v425_v34, %s740_s13  ;;  %v907_v34 = vld [vmem:[#allocation6 + $0x6] ss:$8 sm:$0xf] }
  0x58   :  { %v423_v35 = vld.sshfl [vmem:[#allocation1] sm:$0xff pattern:$0x75316420]  ;;  %v424_v37 = vld.sshfl [vmem:[#allocation1 + $0x8] sm:$0xff pattern:$0x75316420] }
  0x59   :  { %380 = vrot.lane.b32.xlu0 %v370_v30, %s739_s12  ;;  %431 = vrot.lane.b32.xlu1 %v423_v35, %s740_s13  ;;  %v903_v30 = vld [vmem:[#allocation6 + $0x20] ss:$8 sm:$0xf]  ;;  %v351_v35 = vperm.slane %v907_v34, 2 }
  0x5e   :  { %437 = vrot.lane.b32.xlu2 %v426_v36, %s740_s13  ;;  %v449_v36 = vperm.slane %v903_v30, 2 }
  0x61   :  { %378 = vrot.lane.b32.xlu0 %v369_v32, %s739_s12  ;;  %208 = vrot.lane.b32.xlu1 %v200_v16, %s736_s9 }
  0x66   :  { %280 = vrot.lane.b32.xlu2 %v271_v25, %s737_s10 }
  0x69   :  { %335 = vrot.lane.b32.xlu0 %v326_v29, %s738_s11  ;;  %433 = vrot.lane.b32.xlu1 %v424_v37, %s740_s13 }
  0x6e   :  { %110 = vrot.lane.b32.xlu2 %v800_v9, %s734_s0 }
  0x70   :  { %v836_v38 = vpop.permute.xlu2 %68 }
  0x71   :  { %165 = vrot.lane.b32.xlu0 %v807_v13, %s735_s8  ;;  %66 = vrot.lane.b32.xlu1 %v794_v4, %s733_s4  ;;  %v226_v13 = vperm.slane %v885_v8, 2 }
  0x78   :  { %v838_v40 = vpop.permute.xlu2 %116 }
  0x80   :  { %v855_v51 = vpop.permute.xlu2 %171 }
  0x86   :  { %v847_v45 = vpop.permute.xlu1 %72  ;;  %v71_v46 = vpop.permute.xlu0 %70 }
  0x87   :  { %v77_v47 = vsel %vm76_vm0, %v71_v46, %v847_v45  ;;  %v78_v48 = vsel %vm76_vm0, %v836_v38, %v71_v46 }
  0x88   :  { %v93_v49 = vmul.f32 %v85_v43, %v78_v48  ;;  %v94_v50 = vmul.f32 %v86_v44, %v77_v47  ;;  %v870_v62 = vpop.permute.xlu2 %214  ;;  %v352_v47 = vperm.slane %v907_v34, 3 }
  0x8a   :  { %97 = vst [vmem:[#allocation2 + $0x50] sm:$0xf] %v93_v49 }
  0x8b   :  { %98 = vst [vmem:[#allocation2 + $0x18] sm:$0xf] %v94_v50 }
  0x8e   :  { %v115_v54 = vpop.permute.xlu1 %114 }
  0x8f   :  { %v119_v56 = vsel %vm118_vm1, %v115_v54, %v838_v40 }
  0x90   :  { %v137_v57 = vmul.f32 %v129_v53, %v119_v56  ;;  %v865_v58 = vpop.permute.xlu0 %112  ;;  %v295_v56 = vperm.slane %v292_v22, 1 }
  0x91   :  { %v120_v59 = vsel %vm118_vm1, %v865_v58, %v115_v54 }
  0x92   :  { %v145_v60 = vrot.slane %v137_v57, 4  ;;  %v136_v61 = vmul.f32 %v128_v55, %v120_v59  ;;  %v294_v55 = vperm.slane %v292_v22, 0  ;;  %v390_v57 = vld [vmem:[#allocation6 + $0x7] ss:$8 sm:$0xf] }
  0x94   :  { %153 = vst [vmem:[#allocation2 + $0x18] sm:$0xf0] %v145_v60  ;;  %v144_v0 = vrot.slane %v136_v61, 4 }
  0x96   :  { %152 = vst [vmem:[#allocation2 + $0x50] sm:$0xf0] %v144_v0  ;;  %v170_v2 = vpop.permute.xlu1 %169 }
  0x97   :  { %v174_v4 = vsel %vm173_vm2, %v170_v2, %v855_v51 }
  0x98   :  { %v192_v5 = vmul.f32 %v184_v1, %v174_v4  ;;  %v880_v6 = vpop.permute.xlu0 %167  ;;  %v285_v11 = vpop.permute.xlu2 %284  ;;  %v395_v1 = vperm.slane %v390_v57, 3 }
  0x99   :  { %v175_v7 = vsel %vm173_vm2, %v880_v6, %v170_v2 }
  0x9a   :  { %196 = vst [vmem:[#allocation2 + $0x80] sm:$0xf] %v192_v5  ;;  %v191_v9 = vmul.f32 %v183_v3, %v175_v7 }
  0x9c   :  { %195 = vst [vmem:[#allocation2 + $0x78] sm:$0xf] %v191_v9 }
  0x9e   :  { %v213_v12 = vpop.permute.xlu1 %212 }
  0x9f   :  { %v217_v14 = vsel %vm216_vm3, %v213_v12, %v870_v62 }
  0xa0   :  { %v235_v15 = vmul.f32 %v227_v10, %v217_v14  ;;  %v893_v16 = vpop.permute.xlu0 %210  ;;  %v340_v21 = vpop.permute.xlu2 %339 }
  0xa1   :  { %v218_v17 = vsel %vm216_vm3, %v893_v16, %v213_v12  ;;  %v126_v12 = vperm.slane %v857_v52, 0 }
  0xa2   :  { %v243_v18 = vrot.slane %v235_v15, 4  ;;  %v234_v19 = vmul.f32 %v226_v13, %v218_v17  ;;  %v127_v13 = vperm.slane %v857_v52, 1 }
  0xa4   :  { %251 = vst [vmem:[#allocation2 + $0x80] sm:$0xf0] %v243_v18  ;;  %v242_v20 = vrot.slane %v234_v19, 4  ;;  %v394_v19 = vperm.slane %v390_v57, 2 }
  0xa6   :  { %250 = vst [vmem:[#allocation2 + $0x78] sm:$0xf0] %v242_v20  ;;  %v450_v20 = vperm.slane %v903_v30, 3 }
  0xb0   :  { %v283_v24 = vpop.permute.xlu1 %282  ;;  %v899_v25 = vpop.permute.xlu2 %435 }
  0xb1   :  { %v287_v26 = vsel %vm286_vm4, %v283_v24, %v285_v11 }
  0xb2   :  { %v304_v28 = vmul.f32 %v296_v23, %v287_v26 }
  0xb3   :  { %v279_v29 = vpop.permute.xlu0 %278 }
  0xb4   :  { %v312_v31 = vrot.slane %v304_v28, 4  ;;  %v290_v32 = vsel %vm286_vm4, %v285_v11, %v279_v29 }
  0xb5   :  { %v305_v33 = vmul.f32 %v297_v27, %v290_v32  ;;  %v393_v32 = vperm.slane %v390_v57, 1 }
  0xb6   :  { %320 = vst [vmem:[#allocation2 + $0x28] sm:$0xf0] %v312_v31  ;;  %v392_v31 = vperm.slane %v390_v57, 0 }
  0xb7   :  { %v313_v37 = vrot.slane %v305_v33, 4  ;;  %v224_v33 = vperm.slane %v885_v8, 0 }
  0xb8   :  { %v913_v39 = vpop.permute.xlu1 %337  ;;  %v438_v43 = vpop.permute.xlu2 %437 }
  0xb9   :  { %321 = vst [vmem:[#allocation2 + $0x40] sm:$0xf0] %v313_v37  ;;  %v342_v44 = vsel %vm341_vm6, %v913_v39, %v340_v21  ;;  %v440_v46 = vsel %vm439_vm5, %v899_v25, %v438_v43 }
  0xba   :  { %v359_v48 = vmul.f32 %v351_v35, %v342_v44  ;;  %v457_v49 = vmul.f32 %v449_v36, %v440_v46  ;;  %v225_v35 = vperm.slane %v885_v8, 1  ;;  %v591_v44 = vld [vmem:[%s1014_s3] sm:$0xff] }
  0xbb   :  { %v922_v50 = vpop.permute.xlu0 %333 }
  0xbc   :  { %363 = vst [vmem:[#allocation2 + $0x98] sm:$0xf] %v359_v48  ;;  %v345_v53 = vsel %vm341_vm6, %v340_v21, %v922_v50  ;;  %v741_v48 = vmov 0  }
  0xbd   :  { %461 = vst [vmem:[#allocation2 + $0x70] sm:$0xf] %v457_v49  ;;  %v360_v54 = vmul.f32 %v352_v47, %v345_v53  ;;  %650 = vset.pattern.permute.xlu0 %v741_v48  ;;  %v581_v49 = vld [vmem:[%s1013_s2] sm:$0xff]  ;;  %649 = vset.pattern.permute.xlu2 %v741_v48  ;;  %s742_s2 = smov [#allocation8]  }
  0xbe   :  { %594 = vperm.xlu0 %650, %v591_v44   ;;  %584 = vperm.xlu2 %649, %v581_v49   ;;  %s614_s3 = sshll.u32 %s742_s2, 4  ;;  %s615_s3 = int_to_ptr.vmem [resolvable:$true] %s614_s3 }
  0xbf   :  { %364 = vst [vmem:[#allocation2 + $0x60] sm:$0xf] %v360_v54 }
  0xc0   :  { %v281_v59 = vpop.permute.xlu2 %280  ;;  %v383_v60 = vpop.permute.xlu1 %382 }
  0xc1   :  { %v288_v61 = vsel %vm286_vm4, %v281_v59, %v283_v24  ;;  %v289_v0 = vsel %vm286_vm4, %v279_v29, %v281_v59 }
  0xc2   :  { %v302_v2 = vmul.f32 %v294_v55, %v289_v0  ;;  %v303_v3 = vmul.f32 %v295_v56, %v288_v61 }
  0xc3   :  { %v377_v4 = vpop.permute.xlu0 %376 }
  0xc4   :  { %v310_v5 = vrot.slane %v302_v2, 4  ;;  %v311_v7 = vrot.slane %v303_v3, 4  ;;  %v388_v9 = vsel %vm384_vm7, %v383_v60, %v377_v4  ;;  %v482_v10 = vld [vmem:[#allocation2 + $0x70] sm:$0xf]  ;;  %v350_v2 = vperm.slane %v907_v34, 1  ;;  %v474_v3 = vld [vmem:[#allocation2 + $0x28] sm:$0xff] }
  0xc5   :  { %v403_v11 = vmul.f32 %v395_v1, %v388_v9  ;;  %631 = vmatpush.msk.msra.mxu2 %vm488_vm8, %v482_v10  ;;  %v349_v1 = vperm.slane %v907_v34, 0  ;;  %v475_v9 = vld [vmem:[#allocation2 + $0x40] sm:$0xff] }
  0xc6   :  { %318 = vst [vmem:[#allocation2 + $0x8] sm:$0xf0] %v310_v5  ;;  %v448_v5 = vperm.slane %v903_v30, 1 }
  0xc7   :  { %319 = vst [vmem:[#allocation2 + $0x88] sm:$0xf0] %v311_v7  ;;  %v411_v14 = vrot.slane %v403_v11, 4 }
  0xc8   :  { %v111_v15 = vpop.permute.xlu2 %110 }
  0xc9   :  { %419 = vst [vmem:[#allocation2 + $0x60] sm:$0xf0] %v411_v14  ;;  %v121_v17 = vsel %vm118_vm1, %v111_v15, %v865_v58  ;;  %v122_v18 = vsel %vm118_vm1, %v838_v40, %v111_v15 }
  0xca   :  { %v134_v21 = vmul.f32 %v126_v12, %v122_v18  ;;  %v135_v22 = vmul.f32 %v127_v13, %v121_v17  ;;  %v471_v17 = vld [vmem:[#allocation2 + $0x80] sm:$0xff] }
  0xcb   :  { %v381_v23 = vpop.permute.xlu0 %380  ;;  %v944_v24 = vpop.permute.xlu1 %431  ;;  %v463_v18 = vld [vmem:[#allocation3] sm:$0xff] }
  0xcc   :  { %v142_v52 = vrot.slane %v134_v21, 4  ;;  %v143_v26 = vrot.slane %v135_v22, 4  ;;  %v385_v27 = vsel %vm384_vm7, %v381_v23, %v383_v60  ;;  %v443_v58 = vsel %vm439_vm5, %v438_v43, %v944_v24 }
  0xcd   :  { %v402_v28 = vmul.f32 %v394_v19, %v385_v27  ;;  %v458_v29 = vmul.f32 %v450_v20, %v443_v58  ;;  %v467_v20 = vld [vmem:[#allocation2 + $0x18] sm:$0xff]  ;;  %v182_v21 = vperm.slane %v872_v63, 1  ;;  %v83_v22 = vperm.slane %v842_v42, 0  ;;  %v472_v41 = vld [vmem:[#allocation2 + $0x8] sm:$0xff] }
  0xce   :  { %150 = vst [vmem:[#allocation2] sm:$0xf0] %v142_v52 }
  0xcf   :  { %151 = vst [vmem:[#allocation2 + $0x38] sm:$0xf0] %v143_v26  ;;  %v410_v40 = vrot.slane %v402_v28, 4 }
  0xd0   :  { %462 = vst [vmem:[#allocation2 + $0x90] sm:$0xf] %v458_v29  ;;  %v479_v0 = vld [vmem:[#allocation2 + $0x60] sm:$0xff] }
  0xd1   :  { %418 = vst [vmem:[#allocation2 + $0x98] sm:$0xf0] %v410_v40 }
  0xd3   :  { %v379_v36 = vpop.permute.xlu0 %378  ;;  %v209_v37 = vpop.permute.xlu1 %208 }
  0xd4   :  { %v386_v43 = vsel %vm384_vm7, %v379_v36, %v381_v23  ;;  %v387_v46 = vsel %vm384_vm7, %v377_v4, %v379_v36  ;;  %v219_v47 = vsel %vm216_vm3, %v209_v37, %v893_v16  ;;  %v220_v8 = vsel %vm216_vm3, %v870_v62, %v209_v37 }
  0xd5   :  { %v400_v53 = vmul.f32 %v392_v31, %v387_v46  ;;  %v401_v54 = vmul.f32 %v393_v32, %v386_v43  ;;  %v232_v55 = vmul.f32 %v224_v33, %v220_v8  ;;  %v233_v56 = vmul.f32 %v225_v35, %v219_v47 }
  0xd6   :  { %v447_v4 = vperm.slane %v903_v30, 0  ;;  %v470_v30 = vld [vmem:[#allocation2 + $0x78] sm:$0xff]  ;;  %v84_v23 = vperm.slane %v842_v42, 1 }
  0xd7   :  { %v408_v57 = vrot.slane %v400_v53, 4  ;;  %v409_v59 = vrot.slane %v401_v54, 4  ;;  %v240_v60 = vrot.slane %v232_v55, 4  ;;  %v483_v16 = vld [vmem:[#allocation2 + $0x90] sm:$0xf]  ;;  %v241_v61 = vrot.slane %v233_v56, 4 }
  0xd8   :  { %633 = vmatpush.msk.msra.mxu3 %vm488_vm8, %v483_v16  ;;  %v478_v62 = vld [vmem:[#allocation2 + $0x98] sm:$0xff] }
  0xd9   :  { %416 = vst [vmem:[#allocation2 + $0x58] sm:$0xf0] %v408_v57  ;;  %553 = vmatpush.msra.mxu2 %v478_v62 }
  0xda   :  { %417 = vst [vmem:[#allocation2 + $0x10] sm:$0xf0] %v409_v59  ;;  %573 = vmatpush.msra.mxu3 %v479_v0 }
  0xdb   :  { %248 = vst [vmem:[#allocation2 + $0x30] sm:$0xf0] %v240_v60  ;;  %554 = vmatpush.msra.mxu2 %v474_v3  ;;  %v336_v7 = vpop.permute.xlu0 %335  ;;  %v434_v10 = vpop.permute.xlu1 %433 }
  0xdc   :  { %249 = vst [vmem:[#allocation2 + $0x68] sm:$0xf0] %v241_v61  ;;  %v343_v11 = vsel %vm341_vm6, %v336_v7, %v913_v39  ;;  %v344_v34 = vsel %vm341_vm6, %v922_v50, %v336_v7  ;;  %574 = vmatpush.msra.mxu3 %v475_v9  ;;  %v441_v12 = vsel %vm439_vm5, %v434_v10, %v899_v25  ;;  %v466_v50 = vld [vmem:[#allocation2 + $0x50] sm:$0xff]  ;;  %v181_v25 = vperm.slane %v872_v63, 0 }
  0xdd   :  { %v357_v13 = vmul.f32 %v349_v1, %v344_v34  ;;  %v358_v14 = vmul.f32 %v350_v2, %v343_v11  ;;  %v442_v15 = vsel %vm439_vm5, %v944_v24, %v434_v10  ;;  %555 = vmatpush.msra.mxu2 %v470_v30  ;;  %v456_v19 = vmul.f32 %v448_v5, %v441_v12 }
  0xde   :  { %v455_v39 = vmul.f32 %v447_v4, %v442_v15  ;;  %575 = vmatpush.msra.mxu3 %v471_v17 }
  0xdf   :  { %361 = vst [vmem:[#allocation2 + $0x58] sm:$0xf] %v357_v13  ;;  %556 = vmatpush.msra.mxu2 %v466_v50 }
  0xe0   :  { %362 = vst [vmem:[#allocation2 + $0x10] sm:$0xf] %v358_v14  ;;  %576 = vmatpush.msra.mxu3 %v467_v20  ;;  %632 = vmatmul.msk.f32.vlgmr.msra.gmra.mxu2 %vm484_vm9, %v463_v18 }
  0xe1   :  { %459 = vst [vmem:[#allocation2 + $0x20] sm:$0xf] %v455_v39  ;;  %634 = vmatmul.msk.f32.vlgmr.msra.gmra.mxu3 %vm484_vm9, %v463_v18 }
  0xe2   :  { %460 = vst [vmem:[#allocation2 + $0x48] sm:$0xf] %v456_v19 }
  0xe3   :  { %v166_v24 = vpop.permute.xlu0 %165  ;;  %v67_v52 = vpop.permute.xlu1 %66 }
  0xe4   :  { %v176_v26 = vsel %vm173_vm2, %v166_v24, %v880_v6  ;;  %v177_v27 = vsel %vm173_vm2, %v855_v51, %v166_v24  ;;  %v79_v63 = vsel %vm76_vm0, %v67_v52, %v836_v38  ;;  %v80_v58 = vsel %vm76_vm0, %v847_v45, %v67_v52  ;;  %v473_v45 = vld [vmem:[#allocation2 + $0x88] sm:$0xff] }
  0xe5   :  { %v189_v28 = vmul.f32 %v181_v25, %v177_v27  ;;  %v190_v42 = vmul.f32 %v182_v21, %v176_v26  ;;  %v91_v29 = vmul.f32 %v83_v22, %v80_v58  ;;  %v92_v40 = vmul.f32 %v84_v23, %v79_v63 }
  0xe6   :  { %v476_v51 = vld [vmem:[#allocation2 + $0x58] sm:$0xff] }
  0xe7   :  { %193 = vst [vmem:[#allocation2 + $0x30] sm:$0xf] %v189_v28  ;;  %v477_v38 = vld [vmem:[#allocation2 + $0x10] sm:$0xff] }
  0xe8   :  { %194 = vst [vmem:[#allocation2 + $0x68] sm:$0xf] %v190_v42  ;;  %v480_v31 = vld [vmem:[#allocation2 + $0x20] sm:$0xf] }
  0xe9   :  { %95 = vst [vmem:[#allocation2] sm:$0xf] %v91_v29  ;;  %627 = vmatpush.msk.msra.mxu0 %vm488_vm8, %v480_v31  ;;  %v481_v6 = vld [vmem:[#allocation2 + $0x48] sm:$0xf] }
  0xea   :  { %96 = vst [vmem:[#allocation2 + $0x38] sm:$0xf] %v92_v40  ;;  %629 = vmatpush.msk.msra.mxu1 %vm488_vm8, %v481_v6 }
  0xeb   :  { %513 = vmatpush.msra.mxu0 %v476_v51 }
  0xec   :  { %533 = vmatpush.msra.mxu1 %v477_v38 }
  0xed   :  { %514 = vmatpush.msra.mxu0 %v472_v41 }
  0xee   :  { %534 = vmatpush.msra.mxu1 %v473_v45  ;;  %v468_v32 = vld [vmem:[#allocation2 + $0x30] sm:$0xff] }
  0xef   :  { %515 = vmatpush.msra.mxu0 %v468_v32  ;;  %v469_v33 = vld [vmem:[#allocation2 + $0x68] sm:$0xff] }
  0xf0   :  { %535 = vmatpush.msra.mxu1 %v469_v33  ;;  %v464_v35 = vld [vmem:[#allocation2] sm:$0xff] }
  0xf1   :  { %516 = vmatpush.msra.mxu0 %v464_v35  ;;  %v465_v36 = vld [vmem:[#allocation2 + $0x38] sm:$0xff] }
  0xf2   :  { %536 = vmatpush.msra.mxu1 %v465_v36  ;;  %628 = vmatmul.msk.f32.vlgmr.msra.gmra.mxu0 %vm484_vm9, %v463_v18 }
  0xf3   :  { %630 = vmatmul.msk.f32.vlgmr.msra.gmra.mxu1 %vm484_vm9, %v463_v18 }
 0x118   :  { %v585_v37 = vpop.permute.xlu2 %584 }
 0x130   :  { %v595_v43 = vpop.permute.xlu0 %594 }
 0x163   :  { %v558_v44 = vpop.f32.mrf.mxu2 }
 0x164   :  { %v589_v46 = vmul.f32 %v585_v37, %v558_v44  ;;  %v578_v47 = vpop.f32.mrf.mxu3 }
 0x165   :  { %v590_v8 = vmul.f32 %v585_v37, %v578_v47 }
 0x166   :  { %v599_v48 = vadd.f32 %v595_v43, %v589_v46 }
 0x167   :  { %v600_v49 = vadd.f32 %v595_v43, %v590_v8 }
 0x168   :  { %v603_v53 = vmax.f32 %v599_v48, 0.0 }
 0x169   :  { %v604_v54 = vmax.f32 %v600_v49, 0.0 }
 0x16a   :  { %607 = vst [vmem:[#allocation8 + $0x10] sm:$0xff] %v603_v53 }
 0x16b   :  { %608 = vst [vmem:[#allocation8 + $0x18] sm:$0xff] %v604_v54 }
 0x16f   :  { %v518_v55 = vpop.f32.mrf.mxu0 }
 0x170   :  { %v587_v56 = vmul.f32 %v585_v37, %v518_v55  ;;  %v538_v57 = vpop.f32.mrf.mxu1 }
 0x171   :  { %v588_v59 = vmul.f32 %v585_v37, %v538_v57 }
 0x172   :  { %v597_v60 = vadd.f32 %v595_v43, %v587_v56 }
 0x173   :  { %v598_v16 = vadd.f32 %v595_v43, %v588_v59 }
 0x174   :  { %v601_v61 = vmax.f32 %v597_v60, 0.0 }
 0x175   :  { %v602_v62 = vmax.f32 %v598_v16, 0.0 }
 0x176   :  { %605 = vst [vmem:[#allocation8] sm:$0xff] %v601_v61 }
 0x177   :  { %606 = vst [vmem:[#allocation8 + $0x8] sm:$0xff] %v602_v62 }
 0x178   :  { %619 = dma.vmem_to_hbm [thread:$0]  %s615_s3, 512, %s617_s20, [#allocation5]  }
 0x179   :  { %727 = dma.done.wait [#allocation5], 512  }
 0x17a   :  { %728 = vsyncadd [#allocation5], 4294966784 }
 0x17b   :  { %624 = vsyncpa [#allocation4], 1 }
 0x17c   :  { %625 = vsyncpa [#allocation7], 1 }
 0x17d   :  { %626 = vsyncpa [#allocation5], 1 }

</bundles_post_ra>
